<compile_context>
chip_gen: v7x
topology: tpu7x:2x2x1
jax: 0.10.0
libtpu: 0.0.40
codegen_flags: <defaults>
</compile_context>

<pallas_src>
import functools
import math

import jax
import jax.numpy as jnp
from jax import lax
from jax.experimental import pallas as pl
from jax.experimental.pallas import tpu as pltpu


def _round_up(a, b):
    return (a + b - 1) // b * b


# Explicit VMEM budget: above the 32 MiB scoped default, below v7x's 64 MiB
# physical VMEM (v5e/v6e have 128 MiB so this is always safe).
_VMEM_LIMIT = 48 * 1024 * 1024


def _invariant_spec(block_shape, index_map):
    """Grid-invariant (weight/bias) BlockSpec; single-buffered when supported."""
    if hasattr(pl, "Buffered"):
        try:
            return pl.BlockSpec(block_shape, index_map,
                                pipeline_mode=pl.Buffered(1))
        except Exception:  # older jax without pipeline_mode / Buffered(1)
            pass
    return pl.BlockSpec(block_shape, index_map)


# ---------------------------------------------------------------------------
# Kernel 1: QKV projection.  Runs ONE pass over the tokens (review: stop
# recomputing K/V per q-tile).  Outputs are head-major (B, H, Np, dh) so the
# flash kernel can batch heads in a single dot_general and never lane-slices
# a packed (h d) activation.  Softmax scale is folded into Wq on the host.
# ---------------------------------------------------------------------------
def _qkv_proj_kernel(x_ref, wq_ref, wk_ref, wv_ref, q_ref, k_ref, v_ref, *,
                     heads):
    x = x_ref[0]                                    # (tn, Dp)   bf16
    for h in range(heads):                          # short static loop
        q_ref[0, h, :, :] = jnp.dot(
            x, wq_ref[h], preferred_element_type=jnp.float32).astype(q_ref.dtype)
        k_ref[0, h, :, :] = jnp.dot(
            x, wk_ref[h], preferred_element_type=jnp.float32).astype(k_ref.dtype)
        v_ref[0, h, :, :] = jnp.dot(
            x, wv_ref[h], preferred_element_type=jnp.float32).astype(v_ref.dtype)


# ---------------------------------------------------------------------------
# Kernel 2: flash attention + output projection.
# grid = (B, q-tiles, kv-tiles); kv axis last ("arbitrary") carries the online
# softmax state (f32 m / l / acc scratch); output is written at the last kv
# step.  Padded key columns (when N was padded to a tile multiple) get -inf.
# ---------------------------------------------------------------------------
def _flash_kernel(q_ref, k_ref, v_ref, wo_ref, bo_ref, o_ref,
                  m_sc, l_sc, acc_sc, *, heads, seq_len, tkv, kv_padded):
    ki = pl.program_id(2)
    nk = pl.num_programs(2)
    cdt = q_ref.dtype                               # bf16 MXU operand dtype

    @pl.when(ki == 0)
    def _init():
        m_sc[...] = jnp.full_like(m_sc, -jnp.inf)
        l_sc[...] = jnp.zeros_like(l_sc)
        acc_sc[...] = jnp.zeros_like(acc_sc)

    q = q_ref[0]                                    # (H, tq,  dh)
    k = k_ref[0]                                    # (H, tkv, dh)
    v = v_ref[0]                                    # (H, tkv, dh)

    # scores (softmax scale already folded into q) -> f32
    s = jnp.einsum('hqd,hkd->hqk', q, k, preferred_element_type=jnp.float32)
    if kv_padded:
        col = ki * tkv + lax.broadcasted_iota(jnp.int32, s.shape, 2)
        s = jnp.where(col < seq_len, s, -jnp.inf)

    m_prev = m_sc[...]
    m_new = jnp.maximum(m_prev, jnp.max(s, axis=-1, keepdims=True))
    alpha = jnp.exp(m_prev - m_new)
    p = jnp.exp(s - m_new)
    l_sc[...] = alpha * l_sc[...] + jnp.sum(p, axis=-1, keepdims=True)
    acc_sc[...] = alpha * acc_sc[...] + jnp.einsum(
        'hqk,hkd->hqd', p.astype(cdt), v, preferred_element_type=jnp.float32)
    m_sc[...] = m_new

    @pl.when(ki == nk - 1)
    def _finalize():
        # Exact divide: runs once per q-tile, so approx reciprocal is not worth
        # the extra error (review correctness note).
        out = (acc_sc[...] / l_sc[...]).astype(cdt)          # (H, tq, dh)
        y = jnp.dot(out[0], wo_ref[0], preferred_element_type=jnp.float32)
        for h in range(1, heads):
            y = y + jnp.dot(out[h], wo_ref[h],
                            preferred_element_type=jnp.float32)
        y = y + bo_ref[...].astype(jnp.float32)              # (1, Dp) broadcast
        o_ref[0] = y.astype(o_ref.dtype)


def attention_forward(x, w_qkv, w_out, b_out, *, heads, dim_head,
                      tq=512, tkv=256, tn=512, compute_dtype=jnp.bfloat16):
    """x: (B, N, D) -> (B, N, D).  Dropout (p=0 / eval) is the identity."""
    B, N, D = x.shape
    inner = heads * dim_head
    scale = dim_head ** (-0.5)

    # ---- lane-dense embedding dim: zero-pad D to a multiple of 128 (inert).
    Dp = _round_up(D, 128)
    pad_d = Dp - D

    # ---- sequence tiling: clamp tiles for small N, pad N up to a tile
    # multiple (no more tq=N fallback -> VMEM stays O(tile^2) for any N).
    tq = max(8, min(tq, _round_up(N, 8)))
    tkv = max(8, min(tkv, _round_up(N, 8)))
    tn = max(8, min(tn, _round_up(N, 8)))
    Np = _round_up(N, math.lcm(tq, tkv, tn))
    pad_n = Np - N
    # v7x has 2 TensorCores sharded over the parallel axes: keep B*(Np/tq) >= 2.
    if B * (Np // tq) < 2 and Np % 16 == 0:
        tq = Np // 2

    cdt = compute_dtype

    # ---- host-side (one-time) weight prep: fold softmax scale into Wq, split
    # into per-head slabs, pad D, cast MXU operands to bf16.
    def per_head_in(w):                     # (D, inner) -> (H, Dp, dh)
        w = w.reshape(D, heads, dim_head).transpose(1, 0, 2)
        return jnp.pad(w, ((0, 0), (0, pad_d), (0, 0))).astype(cdt)

    wq = per_head_in(w_qkv[:, :inner] * scale)
    wk = per_head_in(w_qkv[:, inner:2 * inner])
    wv = per_head_in(w_qkv[:, 2 * inner:])
    wo = jnp.pad(w_out.reshape(heads, dim_head, D),
                 ((0, 0), (0, 0), (0, pad_d))).astype(cdt)
    bo = jnp.pad(b_out.reshape(1, D), ((0, 0), (0, pad_d))).astype(jnp.float32)

    xp = jnp.pad(x, ((0, 0), (0, pad_n), (0, pad_d))) if (pad_n or pad_d) else x
    xp = xp.astype(cdt)

    # ------------------------------------------------------------------ QKV
    qkv_struct = jax.ShapeDtypeStruct((B, heads, Np, dim_head), cdt)
    q, k, v = pl.pallas_call(
        functools.partial(_qkv_proj_kernel, heads=heads),
        out_shape=(qkv_struct, qkv_struct, qkv_struct),
        grid_spec=pltpu.PrefetchScalarGridSpec(
            num_scalar_prefetch=0,
            grid=(B, Np // tn),
            in_specs=[
                pl.BlockSpec((1, tn, Dp), lambda b, ni: (b, ni, 0)),
                _invariant_spec((heads, Dp, dim_head), lambda b, ni: (0, 0, 0)),
                _invariant_spec((heads, Dp, dim_head), lambda b, ni: (0, 0, 0)),
                _invariant_spec((heads, Dp, dim_head), lambda b, ni: (0, 0, 0)),
            ],
            out_specs=(
                pl.BlockSpec((1, heads, tn, dim_head), lambda b, ni: (b, 0, ni, 0)),
                pl.BlockSpec((1, heads, tn, dim_head), lambda b, ni: (b, 0, ni, 0)),
                pl.BlockSpec((1, heads, tn, dim_head), lambda b, ni: (b, 0, ni, 0)),
            ),
        ),
        compiler_params=pltpu.CompilerParams(
            dimension_semantics=("parallel", "parallel"),
            vmem_limit_bytes=_VMEM_LIMIT),
    )(xp, wq, wk, wv)

    # ------------------------------------------------------------ attention
    out = pl.pallas_call(
        functools.partial(_flash_kernel, heads=heads, seq_len=N, tkv=tkv,
                          kv_padded=pad_n > 0),
        out_shape=jax.ShapeDtypeStruct((B, Np, Dp), x.dtype),
        grid_spec=pltpu.PrefetchScalarGridSpec(
            num_scalar_prefetch=0,
            grid=(B, Np // tq, Np // tkv),
            in_specs=[
                pl.BlockSpec((1, heads, tq, dim_head),
                             lambda b, qi, ki: (b, 0, qi, 0)),
                # TODO(synk): if xprof shows the K/V stream DMA exposed, bump
                # these two specs to pipeline_mode=pl.Buffered(3).
                pl.BlockSpec((1, heads, tkv, dim_head),
                             lambda b, qi, ki: (b, 0, ki, 0)),
                pl.BlockSpec((1, heads, tkv, dim_head),
                             lambda b, qi, ki: (b, 0, ki, 0)),
                _invariant_spec((heads, dim_head, Dp), lambda b, qi, ki: (0, 0, 0)),
                _invariant_spec((1, Dp), lambda b, qi, ki: (0, 0)),
            ],
            out_specs=pl.BlockSpec((1, tq, Dp), lambda b, qi, ki: (b, qi, 0)),
            scratch_shapes=[
                pltpu.VMEM((heads, tq, 1), jnp.float32),          # running max
                pltpu.VMEM((heads, tq, 1), jnp.float32),          # running sum
                pltpu.VMEM((heads, tq, dim_head), jnp.float32),   # accumulator
            ],
        ),
        compiler_params=pltpu.CompilerParams(
            dimension_semantics=("parallel", "parallel", "arbitrary"),
            vmem_limit_bytes=_VMEM_LIMIT),
    )(q, k, v, wo, bo)

    return out[:, :N, :D] if (pad_n or pad_d) else out


def attention_reference(x, w_qkv, w_out, b_out, *, heads, dim_head):
    """Pure-JAX reference mirroring the PyTorch forward."""
    B, N, D = x.shape
    inner = heads * dim_head
    scale = dim_head ** (-0.5)
    qkv = jnp.einsum('bnd,de->bne', x, w_qkv)
    q, k, v = jnp.split(qkv, 3, axis=-1)

    def to_heads(t):  # b n (h d) -> b h n d
        return t.reshape(B, N, heads, dim_head).transpose(0, 2, 1, 3)

    q, k, v = map(to_heads, (q, k, v))
    dots = jnp.einsum('bhnd,bhmd->bhnm', q, k) * scale
    attn = jax.nn.softmax(dots, axis=-1)
    out = jnp.einsum('bhnm,bhmd->bhnd', attn, v)
    out = out.transpose(0, 2, 1, 3).reshape(B, N, inner)
    return jnp.einsum('bne,ed->bnd', out, w_out) + b_out


if __name__ == "__main__":
    # Setup consistent with the module: dim=32, heads=4, dim_head=16 -> inner=64.
    heads, dim_head = 4, 16
    D = 32
    inner = heads * dim_head

    key = jax.random.PRNGKey(0)
    kx, kq, ko, kb, kx2 = jax.random.split(key, 5)

    w_qkv = jax.random.normal(kq, (D, 3 * inner), dtype=jnp.float32) * 0.05
    w_out = jax.random.normal(ko, (inner, D), dtype=jnp.float32) * 0.05
    b_out = jax.random.normal(kb, (1, D), dtype=jnp.float32) * 0.05

    # Case 1: small shapes (batch=2, seq=8, dim=32); single kv tile.
    x1 = jax.random.normal(kx, (2, 8, D), dtype=jnp.float32)
    y1 = jax.block_until_ready(
        attention_forward(x1, w_qkv, w_out, b_out, heads=heads, dim_head=dim_head))
    r1 = attention_reference(x1, w_qkv, w_out, b_out, heads=heads, dim_head=dim_head)
    assert y1.shape == x1.shape
    # bf16 MXU operands -> slightly looser tolerance than a pure-f32 run
    assert jnp.allclose(y1, r1, atol=2e-2, rtol=2e-2), "case 1 mismatch vs reference"

    # Case 2: N=40 with 16-wide tiles -> exercises N-padding + key masking and
    # multi-tile online-softmax accumulation.
    x2 = jax.random.normal(kx2, (1, 40, D), dtype=jnp.float32)
    y2 = jax.block_until_ready(
        attention_forward(x2, w_qkv, w_out, b_out, heads=heads, dim_head=dim_head,
                          tq=16, tkv=16, tn=16))
    r2 = attention_reference(x2, w_qkv, w_out, b_out, heads=heads, dim_head=dim_head)
    assert y2.shape == x2.shape
    assert jnp.allclose(y2, r2, atol=2e-2, rtol=2e-2), "case 2 mismatch vs reference"

    print("KERNEL_OK")
</pallas_src>

<mosaic_0001>
module attributes {stable_mosaic.version = 11 : i64} {
  func.func @_qkv_proj_kernel(%arg0: i32, %arg1: i32, %arg2: memref<1x8x128xbf16, #tpu.memory_space<vmem>>, %arg3: memref<4x128x16xbf16, #tpu.memory_space<vmem>>, %arg4: memref<4x128x16xbf16, #tpu.memory_space<vmem>>, %arg5: memref<4x128x16xbf16, #tpu.memory_space<vmem>>, %arg6: memref<1x4x8x16xbf16, #tpu.memory_space<vmem>>, %arg7: memref<1x4x8x16xbf16, #tpu.memory_space<vmem>>, %arg8: memref<1x4x8x16xbf16, #tpu.memory_space<vmem>>) attributes {dimension_semantics = [#tpu.dimension_semantics<parallel>, #tpu.dimension_semantics<parallel>], iteration_bounds = array<i64: 2, 1>, scalar_prefetch = 0 : i64, scratch_operands = 0 : i64, tpu.core_type = #tpu.core_type<tc>, window_params = [{transform_indices = @transform_0, window_bounds = array<i64: 1, 8, 128>}, {pipeline_mode = #tpu.pipeline_mode<synchronous>, transform_indices = @transform_1, window_bounds = array<i64: 4, 128, 16>}, {pipeline_mode = #tpu.pipeline_mode<synchronous>, transform_indices = @transform_2, window_bounds = array<i64: 4, 128, 16>}, {pipeline_mode = #tpu.pipeline_mode<synchronous>, transform_indices = @transform_3, window_bounds = array<i64: 4, 128, 16>}, {transform_indices = @transform_4, window_bounds = array<i64: 1, 4, 8, 16>}, {transform_indices = @transform_5, window_bounds = array<i64: 1, 4, 8, 16>}, {transform_indices = @transform_6, window_bounds = array<i64: 1, 4, 8, 16>}]} {
    %c0 = arith.constant 0 : index
    %c0_0 = arith.constant 0 : index
    %c0_1 = arith.constant 0 : index
    %0 = vector.load %arg2[%c0, %c0_0, %c0_1] : memref<1x8x128xbf16, #tpu.memory_space<vmem>>, vector<1x8x128xbf16>
    %1 = vector.shape_cast %0 : vector<1x8x128xbf16> to vector<8x128xbf16>
    %c0_2 = arith.constant 0 : index
    %c0_3 = arith.constant 0 : index
    %c0_4 = arith.constant 0 : index
    %2 = vector.load %arg3[%c0_2, %c0_3, %c0_4] : memref<4x128x16xbf16, #tpu.memory_space<vmem>>, vector<1x128x16xbf16>
    %3 = vector.shape_cast %2 : vector<1x128x16xbf16> to vector<128x16xbf16>
    %cst = arith.constant dense<0.000000e+00> : vector<8x16xf32>
    %4 = tpu.matmul %1, %3, %cst {dimension_numbers = #tpu.dot_dimension_numbers<[1], [0], [0], [1], [0, 0, 1, 1], [], []>} : vector<8x128xbf16>, vector<128x16xbf16>, vector<8x16xf32> -> vector<8x16xf32>
    %5 = arith.truncf %4 : vector<8x16xf32> to vector<8x16xbf16>
    %c0_5 = arith.constant 0 : index
    %c0_6 = arith.constant 0 : index
    %c0_7 = arith.constant 0 : index
    %c0_8 = arith.constant 0 : index
    %6 = vector.load %arg6[%c0_5, %c0_6, %c0_7, %c0_8] : memref<1x4x8x16xbf16, #tpu.memory_space<vmem>>, vector<1x1x8x16xbf16>
    %7 = vector.shape_cast %6 : vector<1x1x8x16xbf16> to vector<8x16xbf16>
    %8 = vector.shape_cast %5 : vector<8x16xbf16> to vector<1x1x8x16xbf16>
    tpu.vector_store %arg6[%c0_5, %c0_6, %c0_7, %c0_8], %8 {strides = array<i32>} : memref<1x4x8x16xbf16, #tpu.memory_space<vmem>>, vector<1x1x8x16xbf16>,
    %c0_9 = arith.constant 0 : index
    %c0_10 = arith.constant 0 : index
    %c0_11 = arith.constant 0 : index
    %9 = vector.load %arg4[%c0_9, %c0_10, %c0_11] : memref<4x128x16xbf16, #tpu.memory_space<vmem>>, vector<1x128x16xbf16>
    %10 = vector.shape_cast %9 : vector<1x128x16xbf16> to vector<128x16xbf16>
    %cst_12 = arith.constant dense<0.000000e+00> : vector<8x16xf32>
    %11 = tpu.matmul %1, %10, %cst_12 {dimension_numbers = #tpu.dot_dimension_numbers<[1], [0], [0], [1], [0, 0, 1, 1], [], []>} : vector<8x128xbf16>, vector<128x16xbf16>, vector<8x16xf32> -> vector<8x16xf32>
    %12 = arith.truncf %11 : vector<8x16xf32> to vector<8x16xbf16>
    %c0_13 = arith.constant 0 : index
    %c0_14 = arith.constant 0 : index
    %c0_15 = arith.constant 0 : index
    %c0_16 = arith.constant 0 : index
    %13 = vector.load %arg7[%c0_13, %c0_14, %c0_15, %c0_16] : memref<1x4x8x16xbf16, #tpu.memory_space<vmem>>, vector<1x1x8x16xbf16>
    %14 = vector.shape_cast %13 : vector<1x1x8x16xbf16> to vector<8x16xbf16>
    %15 = vector.shape_cast %12 : vector<8x16xbf16> to vector<1x1x8x16xbf16>
    tpu.vector_store %arg7[%c0_13, %c0_14, %c0_15, %c0_16], %15 {strides = array<i32>} : memref<1x4x8x16xbf16, #tpu.memory_space<vmem>>, vector<1x1x8x16xbf16>,
    %c0_17 = arith.constant 0 : index
    %c0_18 = arith.constant 0 : index
    %c0_19 = arith.constant 0 : index
    %16 = vector.load %arg5[%c0_17, %c0_18, %c0_19] : memref<4x128x16xbf16, #tpu.memory_space<vmem>>, vector<1x128x16xbf16>
    %17 = vector.shape_cast %16 : vector<1x128x16xbf16> to vector<128x16xbf16>
    %cst_20 = arith.constant dense<0.000000e+00> : vector<8x16xf32>
    %18 = tpu.matmul %1, %17, %cst_20 {dimension_numbers = #tpu.dot_dimension_numbers<[1], [0], [0], [1], [0, 0, 1, 1], [], []>} : vector<8x128xbf16>, vector<128x16xbf16>, vector<8x16xf32> -> vector<8x16xf32>
    %19 = arith.truncf %18 : vector<8x16xf32> to vector<8x16xbf16>
    %c0_21 = arith.constant 0 : index
    %c0_22 = arith.constant 0 : index
    %c0_23 = arith.constant 0 : index
    %c0_24 = arith.constant 0 : index
    %20 = vector.load %arg8[%c0_21, %c0_22, %c0_23, %c0_24] : memref<1x4x8x16xbf16, #tpu.memory_space<vmem>>, vector<1x1x8x16xbf16>
    %21 = vector.shape_cast %20 : vector<1x1x8x16xbf16> to vector<8x16xbf16>
    %22 = vector.shape_cast %19 : vector<8x16xbf16> to vector<1x1x8x16xbf16>
    tpu.vector_store %arg8[%c0_21, %c0_22, %c0_23, %c0_24], %22 {strides = array<i32>} : memref<1x4x8x16xbf16, #tpu.memory_space<vmem>>, vector<1x1x8x16xbf16>,
    %c1 = arith.constant 1 : index
    %c0_25 = arith.constant 0 : index
    %c0_26 = arith.constant 0 : index
    %23 = vector.load %arg3[%c1, %c0_25, %c0_26] : memref<4x128x16xbf16, #tpu.memory_space<vmem>>, vector<1x128x16xbf16>
    %24 = vector.shape_cast %23 : vector<1x128x16xbf16> to vector<128x16xbf16>
    %cst_27 = arith.constant dense<0.000000e+00> : vector<8x16xf32>
    %25 = tpu.matmul %1, %24, %cst_27 {dimension_numbers = #tpu.dot_dimension_numbers<[1], [0], [0], [1], [0, 0, 1, 1], [], []>} : vector<8x128xbf16>, vector<128x16xbf16>, vector<8x16xf32> -> vector<8x16xf32>
    %26 = arith.truncf %25 : vector<8x16xf32> to vector<8x16xbf16>
    %c0_28 = arith.constant 0 : index
    %c1_29 = arith.constant 1 : index
    %c0_30 = arith.constant 0 : index
    %c0_31 = arith.constant 0 : index
    %27 = vector.load %arg6[%c0_28, %c1_29, %c0_30, %c0_31] : memref<1x4x8x16xbf16, #tpu.memory_space<vmem>>, vector<1x1x8x16xbf16>
    %28 = vector.shape_cast %27 : vector<1x1x8x16xbf16> to vector<8x16xbf16>
    %29 = vector.shape_cast %26 : vector<8x16xbf16> to vector<1x1x8x16xbf16>
    tpu.vector_store %arg6[%c0_28, %c1_29, %c0_30, %c0_31], %29 {strides = array<i32>} : memref<1x4x8x16xbf16, #tpu.memory_space<vmem>>, vector<1x1x8x16xbf16>,
    %c1_32 = arith.constant 1 : index
    %c0_33 = arith.constant 0 : index
    %c0_34 = arith.constant 0 : index
    %30 = vector.load %arg4[%c1_32, %c0_33, %c0_34] : memref<4x128x16xbf16, #tpu.memory_space<vmem>>, vector<1x128x16xbf16>
    %31 = vector.shape_cast %30 : vector<1x128x16xbf16> to vector<128x16xbf16>
    %cst_35 = arith.constant dense<0.000000e+00> : vector<8x16xf32>
    %32 = tpu.matmul %1, %31, %cst_35 {dimension_numbers = #tpu.dot_dimension_numbers<[1], [0], [0], [1], [0, 0, 1, 1], [], []>} : vector<8x128xbf16>, vector<128x16xbf16>, vector<8x16xf32> -> vector<8x16xf32>
    %33 = arith.truncf %32 : vector<8x16xf32> to vector<8x16xbf16>
    %c0_36 = arith.constant 0 : index
    %c1_37 = arith.constant 1 : index
    %c0_38 = arith.constant 0 : index
    %c0_39 = arith.constant 0 : index
    %34 = vector.load %arg7[%c0_36, %c1_37, %c0_38, %c0_39] : memref<1x4x8x16xbf16, #tpu.memory_space<vmem>>, vector<1x1x8x16xbf16>
    %35 = vector.shape_cast %34 : vector<1x1x8x16xbf16> to vector<8x16xbf16>
    %36 = vector.shape_cast %33 : vector<8x16xbf16> to vector<1x1x8x16xbf16>
    tpu.vector_store %arg7[%c0_36, %c1_37, %c0_38, %c0_39], %36 {strides = array<i32>} : memref<1x4x8x16xbf16, #tpu.memory_space<vmem>>, vector<1x1x8x16xbf16>,
    %c1_40 = arith.constant 1 : index
    %c0_41 = arith.constant 0 : index
    %c0_42 = arith.constant 0 : index
    %37 = vector.load %arg5[%c1_40, %c0_41, %c0_42] : memref<4x128x16xbf16, #tpu.memory_space<vmem>>, vector<1x128x16xbf16>
    %38 = vector.shape_cast %37 : vector<1x128x16xbf16> to vector<128x16xbf16>
    %cst_43 = arith.constant dense<0.000000e+00> : vector<8x16xf32>
    %39 = tpu.matmul %1, %38, %cst_43 {dimension_numbers = #tpu.dot_dimension_numbers<[1], [0], [0], [1], [0, 0, 1, 1], [], []>} : vector<8x128xbf16>, vector<128x16xbf16>, vector<8x16xf32> -> vector<8x16xf32>
    %40 = arith.truncf %39 : vector<8x16xf32> to vector<8x16xbf16>
    %c0_44 = arith.constant 0 : index
    %c1_45 = arith.constant 1 : index
    %c0_46 = arith.constant 0 : index
    %c0_47 = arith.constant 0 : index
    %41 = vector.load %arg8[%c0_44, %c1_45, %c0_46, %c0_47] : memref<1x4x8x16xbf16, #tpu.memory_space<vmem>>, vector<1x1x8x16xbf16>
    %42 = vector.shape_cast %41 : vector<1x1x8x16xbf16> to vector<8x16xbf16>
    %43 = vector.shape_cast %40 : vector<8x16xbf16> to vector<1x1x8x16xbf16>
    tpu.vector_store %arg8[%c0_44, %c1_45, %c0_46, %c0_47], %43 {strides = array<i32>} : memref<1x4x8x16xbf16, #tpu.memory_space<vmem>>, vector<1x1x8x16xbf16>,
    %c2 = arith.constant 2 : index
    %c0_48 = arith.constant 0 : index
    %c0_49 = arith.constant 0 : index
    %44 = vector.load %arg3[%c2, %c0_48, %c0_49] : memref<4x128x16xbf16, #tpu.memory_space<vmem>>, vector<1x128x16xbf16>
    %45 = vector.shape_cast %44 : vector<1x128x16xbf16> to vector<128x16xbf16>
    %cst_50 = arith.constant dense<0.000000e+00> : vector<8x16xf32>
    %46 = tpu.matmul %1, %45, %cst_50 {dimension_numbers = #tpu.dot_dimension_numbers<[1], [0], [0], [1], [0, 0, 1, 1], [], []>} : vector<8x128xbf16>, vector<128x16xbf16>, vector<8x16xf32> -> vector<8x16xf32>
    %47 = arith.truncf %46 : vector<8x16xf32> to vector<8x16xbf16>
    %c0_51 = arith.constant 0 : index
    %c2_52 = arith.constant 2 : index
    %c0_53 = arith.constant 0 : index
    %c0_54 = arith.constant 0 : index
    %48 = vector.load %arg6[%c0_51, %c2_52, %c0_53, %c0_54] : memref<1x4x8x16xbf16, #tpu.memory_space<vmem>>, vector<1x1x8x16xbf16>
    %49 = vector.shape_cast %48 : vector<1x1x8x16xbf16> to vector<8x16xbf16>
    %50 = vector.shape_cast %47 : vector<8x16xbf16> to vector<1x1x8x16xbf16>
    tpu.vector_store %arg6[%c0_51, %c2_52, %c0_53, %c0_54], %50 {strides = array<i32>} : memref<1x4x8x16xbf16, #tpu.memory_space<vmem>>, vector<1x1x8x16xbf16>,
    %c2_55 = arith.constant 2 : index
    %c0_56 = arith.constant 0 : index
    %c0_57 = arith.constant 0 : index
    %51 = vector.load %arg4[%c2_55, %c0_56, %c0_57] : memref<4x128x16xbf16, #tpu.memory_space<vmem>>, vector<1x128x16xbf16>
    %52 = vector.shape_cast %51 : vector<1x128x16xbf16> to vector<128x16xbf16>
    %cst_58 = arith.constant dense<0.000000e+00> : vector<8x16xf32>
    %53 = tpu.matmul %1, %52, %cst_58 {dimension_numbers = #tpu.dot_dimension_numbers<[1], [0], [0], [1], [0, 0, 1, 1], [], []>} : vector<8x128xbf16>, vector<128x16xbf16>, vector<8x16xf32> -> vector<8x16xf32>
    %54 = arith.truncf %53 : vector<8x16xf32> to vector<8x16xbf16>
    %c0_59 = arith.constant 0 : index
    %c2_60 = arith.constant 2 : index
    %c0_61 = arith.constant 0 : index
    %c0_62 = arith.constant 0 : index
    %55 = vector.load %arg7[%c0_59, %c2_60, %c0_61, %c0_62] : memref<1x4x8x16xbf16, #tpu.memory_space<vmem>>, vector<1x1x8x16xbf16>
    %56 = vector.shape_cast %55 : vector<1x1x8x16xbf16> to vector<8x16xbf16>
    %57 = vector.shape_cast %54 : vector<8x16xbf16> to vector<1x1x8x16xbf16>
    tpu.vector_store %arg7[%c0_59, %c2_60, %c0_61, %c0_62], %57 {strides = array<i32>} : memref<1x4x8x16xbf16, #tpu.memory_space<vmem>>, vector<1x1x8x16xbf16>,
    %c2_63 = arith.constant 2 : index
    %c0_64 = arith.constant 0 : index
    %c0_65 = arith.constant 0 : index
    %58 = vector.load %arg5[%c2_63, %c0_64, %c0_65] : memref<4x128x16xbf16, #tpu.memory_space<vmem>>, vector<1x128x16xbf16>
    %59 = vector.shape_cast %58 : vector<1x128x16xbf16> to vector<128x16xbf16>
    %cst_66 = arith.constant dense<0.000000e+00> : vector<8x16xf32>
    %60 = tpu.matmul %1, %59, %cst_66 {dimension_numbers = #tpu.dot_dimension_numbers<[1], [0], [0], [1], [0, 0, 1, 1], [], []>} : vector<8x128xbf16>, vector<128x16xbf16>, vector<8x16xf32> -> vector<8x16xf32>
    %61 = arith.truncf %60 : vector<8x16xf32> to vector<8x16xbf16>
    %c0_67 = arith.constant 0 : index
    %c2_68 = arith.constant 2 : index
    %c0_69 = arith.constant 0 : index
    %c0_70 = arith.constant 0 : index
    %62 = vector.load %arg8[%c0_67, %c2_68, %c0_69, %c0_70] : memref<1x4x8x16xbf16, #tpu.memory_space<vmem>>, vector<1x1x8x16xbf16>
    %63 = vector.shape_cast %62 : vector<1x1x8x16xbf16> to vector<8x16xbf16>
    %64 = vector.shape_cast %61 : vector<8x16xbf16> to vector<1x1x8x16xbf16>
    tpu.vector_store %arg8[%c0_67, %c2_68, %c0_69, %c0_70], %64 {strides = array<i32>} : memref<1x4x8x16xbf16, #tpu.memory_space<vmem>>, vector<1x1x8x16xbf16>,
    %c3 = arith.constant 3 : index
    %c0_71 = arith.constant 0 : index
    %c0_72 = arith.constant 0 : index
    %65 = vector.load %arg3[%c3, %c0_71, %c0_72] : memref<4x128x16xbf16, #tpu.memory_space<vmem>>, vector<1x128x16xbf16>
    %66 = vector.shape_cast %65 : vector<1x128x16xbf16> to vector<128x16xbf16>
    %cst_73 = arith.constant dense<0.000000e+00> : vector<8x16xf32>
    %67 = tpu.matmul %1, %66, %cst_73 {dimension_numbers = #tpu.dot_dimension_numbers<[1], [0], [0], [1], [0, 0, 1, 1], [], []>} : vector<8x128xbf16>, vector<128x16xbf16>, vector<8x16xf32> -> vector<8x16xf32>
    %68 = arith.truncf %67 : vector<8x16xf32> to vector<8x16xbf16>
    %c0_74 = arith.constant 0 : index
    %c3_75 = arith.constant 3 : index
    %c0_76 = arith.constant 0 : index
    %c0_77 = arith.constant 0 : index
    %69 = vector.load %arg6[%c0_74, %c3_75, %c0_76, %c0_77] : memref<1x4x8x16xbf16, #tpu.memory_space<vmem>>, vector<1x1x8x16xbf16>
    %70 = vector.shape_cast %69 : vector<1x1x8x16xbf16> to vector<8x16xbf16>
    %71 = vector.shape_cast %68 : vector<8x16xbf16> to vector<1x1x8x16xbf16>
    tpu.vector_store %arg6[%c0_74, %c3_75, %c0_76, %c0_77], %71 {strides = array<i32>} : memref<1x4x8x16xbf16, #tpu.memory_space<vmem>>, vector<1x1x8x16xbf16>,
    %c3_78 = arith.constant 3 : index
    %c0_79 = arith.constant 0 : index
    %c0_80 = arith.constant 0 : index
    %72 = vector.load %arg4[%c3_78, %c0_79, %c0_80] : memref<4x128x16xbf16, #tpu.memory_space<vmem>>, vector<1x128x16xbf16>
    %73 = vector.shape_cast %72 : vector<1x128x16xbf16> to vector<128x16xbf16>
    %cst_81 = arith.constant dense<0.000000e+00> : vector<8x16xf32>
    %74 = tpu.matmul %1, %73, %cst_81 {dimension_numbers = #tpu.dot_dimension_numbers<[1], [0], [0], [1], [0, 0, 1, 1], [], []>} : vector<8x128xbf16>, vector<128x16xbf16>, vector<8x16xf32> -> vector<8x16xf32>
    %75 = arith.truncf %74 : vector<8x16xf32> to vector<8x16xbf16>
    %c0_82 = arith.constant 0 : index
    %c3_83 = arith.constant 3 : index
    %c0_84 = arith.constant 0 : index
    %c0_85 = arith.constant 0 : index
    %76 = vector.load %arg7[%c0_82, %c3_83, %c0_84, %c0_85] : memref<1x4x8x16xbf16, #tpu.memory_space<vmem>>, vector<1x1x8x16xbf16>
    %77 = vector.shape_cast %76 : vector<1x1x8x16xbf16> to vector<8x16xbf16>
    %78 = vector.shape_cast %75 : vector<8x16xbf16> to vector<1x1x8x16xbf16>
    tpu.vector_store %arg7[%c0_82, %c3_83, %c0_84, %c0_85], %78 {strides = array<i32>} : memref<1x4x8x16xbf16, #tpu.memory_space<vmem>>, vector<1x1x8x16xbf16>,
    %c3_86 = arith.constant 3 : index
    %c0_87 = arith.constant 0 : index
    %c0_88 = arith.constant 0 : index
    %79 = vector.load %arg5[%c3_86, %c0_87, %c0_88] : memref<4x128x16xbf16, #tpu.memory_space<vmem>>, vector<1x128x16xbf16>
    %80 = vector.shape_cast %79 : vector<1x128x16xbf16> to vector<128x16xbf16>
    %cst_89 = arith.constant dense<0.000000e+00> : vector<8x16xf32>
    %81 = tpu.matmul %1, %80, %cst_89 {dimension_numbers = #tpu.dot_dimension_numbers<[1], [0], [0], [1], [0, 0, 1, 1], [], []>} : vector<8x128xbf16>, vector<128x16xbf16>, vector<8x16xf32> -> vector<8x16xf32>
    %82 = arith.truncf %81 : vector<8x16xf32> to vector<8x16xbf16>
    %c0_90 = arith.constant 0 : index
    %c3_91 = arith.constant 3 : index
    %c0_92 = arith.constant 0 : index
    %c0_93 = arith.constant 0 : index
    %83 = vector.load %arg8[%c0_90, %c3_91, %c0_92, %c0_93] : memref<1x4x8x16xbf16, #tpu.memory_space<vmem>>, vector<1x1x8x16xbf16>
    %84 = vector.shape_cast %83 : vector<1x1x8x16xbf16> to vector<8x16xbf16>
    %85 = vector.shape_cast %82 : vector<8x16xbf16> to vector<1x1x8x16xbf16>
    tpu.vector_store %arg8[%c0_90, %c3_91, %c0_92, %c0_93], %85 {strides = array<i32>} : memref<1x4x8x16xbf16, #tpu.memory_space<vmem>>, vector<1x1x8x16xbf16>,
    return
  }
  func.func @transform_0(%arg0: i32, %arg1: i32) -> (i32, i32, i32) {
    %c0_i32 = arith.constant 0 : i32
    %c0_i32_0 = arith.constant 0 : i32
    return %arg0, %arg1, %c0_i32 : i32, i32, i32
  }
  func.func @transform_1(%arg0: i32, %arg1: i32) -> (i32, i32, i32) {
    %c0_i32 = arith.constant 0 : i32
    %c0_i32_0 = arith.constant 0 : i32
    %c0_i32_1 = arith.constant 0 : i32
    %c0_i32_2 = arith.constant 0 : i32
    return %c0_i32, %c0_i32_0, %c0_i32_1 : i32, i32, i32
  }
  func.func @transform_2(%arg0: i32, %arg1: i32) -> (i32, i32, i32) {
    %c0_i32 = arith.constant 0 : i32
    %c0_i32_0 = arith.constant 0 : i32
    %c0_i32_1 = arith.constant 0 : i32
    %c0_i32_2 = arith.constant 0 : i32
    return %c0_i32, %c0_i32_0, %c0_i32_1 : i32, i32, i32
  }
  func.func @transform_3(%arg0: i32, %arg1: i32) -> (i32, i32, i32) {
    %c0_i32 = arith.constant 0 : i32
    %c0_i32_0 = arith.constant 0 : i32
    %c0_i32_1 = arith.constant 0 : i32
    %c0_i32_2 = arith.constant 0 : i32
    return %c0_i32, %c0_i32_0, %c0_i32_1 : i32, i32, i32
  }
  func.func @transform_4(%arg0: i32, %arg1: i32) -> (i32, i32, i32, i32) {
    %c0_i32 = arith.constant 0 : i32
    %c0_i32_0 = arith.constant 0 : i32
    %c0_i32_1 = arith.constant 0 : i32
    return %arg0, %c0_i32, %arg1, %c0_i32_0 : i32, i32, i32, i32
  }
  func.func @transform_5(%arg0: i32, %arg1: i32) -> (i32, i32, i32, i32) {
    %c0_i32 = arith.constant 0 : i32
    %c0_i32_0 = arith.constant 0 : i32
    %c0_i32_1 = arith.constant 0 : i32
    return %arg0, %c0_i32, %arg1, %c0_i32_0 : i32, i32, i32, i32
  }
  func.func @transform_6(%arg0: i32, %arg1: i32) -> (i32, i32, i32, i32) {
    %c0_i32 = arith.constant 0 : i32
    %c0_i32_0 = arith.constant 0 : i32
    %c0_i32_1 = arith.constant 0 : i32
    return %arg0, %c0_i32, %arg1, %c0_i32_0 : i32, i32, i32, i32
  }
}

</mosaic_0001>

<bundles_post_ra>
// kernel: tpu_custom_call.1
= control target key start
LH: loop header
LB: loop body
LE: loop exit
PB: predicated region body
PF: predicated region fallthrough
CT: control target
= control target key end

     0   :  { %12 = vsyncpa [#allocation3], 0  ;;  %s3412_s0 = inlined_call_operand.vmem [shape: bf16[2,8,128], index: 0, kind: input, shape index: {}]   ;;  %s3413_s1 = inlined_call_operand.vmem [shape: bf16[4,128,16], index: 1, kind: input, shape index: {}]   ;;  %s3414_s2 = inlined_call_operand.vmem [shape: bf16[4,128,16], index: 2, kind: input, shape index: {}]   ;;  %s3415_s3 = inlined_call_operand.vmem [shape: bf16[4,128,16], index: 3, kind: input, shape index: {}]   ;;  %s3416_s4 = inlined_call_operand.hbm [shape: bf16[2,4,8,16], index: 4, kind: output, shape index: {0}]   ;;  %s3417_s5 = inlined_call_operand.hbm [shape: bf16[2,4,8,16], index: 5, kind: output, shape index: {1}]   ;;  %s3418_s6 = inlined_call_operand.hbm [shape: bf16[2,4,8,16], index: 6, kind: output, shape index: {2}]  }
   0x1   :  { %14 = vsyncpa [#allocation3 + $0x1], 0 }
   0x2   :  { %15 = vsyncpa [#allocation5], 0 }
   0x3   :  { %17 = vsyncpa [#allocation5 + $0x1], 0  ;;  %s2753_s21 = smov 0   ;;  %s2755_s22 = smov 0  }
   0x4   :  { %s2757_s23 = smov 0   ;;  %s2759_s24 = smov 0  }
   0x5   :  { %s2761_s25 = smov 0   ;;  %s2763_s26 = smov 0  }
   0x6 LB: > { %s1786_s27 = sadd.s32 4294967295, %s2709_s26   ;;  %s3419_s28 = sadd.s32 4294967294, %s2709_s26   ;;  %s2709_s26 = sphi %s2763_s26, %s23_s26   ;;  %s2705_s25 = sphi %s2761_s25, %s3430_s25   ;;  %s2701_s24 = sphi %s2759_s24, %s3429_s24   ;;  %s2697_s23 = sphi %s2757_s23, %s3428_s23   ;;  %s2693_s22 = sphi %s2755_s22, %s3427_s22   ;;  %s2689_s21 = sphi %s2753_s21, %s3426_s21  }
   0x7   : > { %s35_s29 = sadd.s32 1, %s2705_s25  ;;  %s135_s30 = sadd.s32 1, %s2697_s23 }
   0x8   : > { %p37_p0 = scmp.ge.s32.totalorder %s35_s29, 2  ;;  %p145_p1 = scmp.ne.s32.totalorder %s2697_s23, %s2693_s22 }
   0x9   : > { %p146_p2 = scmp.eq.s32.totalorder %s1786_s27, 1  ;;  %p151_p3 = scmp.ne.s32.totalorder %s2693_s22, %s2689_s21 }
   0xa   : > { %s3432_s29 = smov (%p37_p0, %s35_s29), 0  ;;  %p152_p5 = scmp.eq.s32.totalorder %s3419_s28, 1 }
   0xb   : > { %p2795_p4 = por %p146_p2, %p145_p1  ;;  %s130_s8 = ssub.s32 %s2705_s25, %s3432_s29 }
   0xc   : > { %p1790_p6 = scmp.ge.s32.totalorder %s2709_s26, 1  ;;  %p133_p7 = scmp.eq.s32.totalorder %s130_s8, 0 }
   0xd   : > { %p2804_p8 = por %p152_p5, %p151_p3  ;;  %p245_p9 = scmp.lt.s32.totalorder %s2709_s26, 3 }
   0xe   : > { %s2810_s10 = scalar_select %p133_p7, %s2697_s23, %s135_s30  }
   0xf   : > { %p246_p10 = pnand %p1790_p6, %p245_p9 }
  0x10   : > { %v2475_v0 = vld [vmem:[%s3413_s1] sm:$0xff] (!%p246_p10)   ;;  %v2711_v1 = vmov (!%p246_p10), 0.0   ;;  %v2477_v3 = vld [vmem:[%s3413_s1 + $0x8] sm:$0xff] (!%p246_p10)   ;;  %vm2712_vm0 = vmmov (!%p246_p10), 0   ;;  %v2479_v5 = vld [vmem:[%s3413_s1 + $0x10] sm:$0xff] (!%p246_p10)   ;;  %p287_p11 = scmp.lt.s32.totalorder (!%p246_p10), %s2701_s24, 1 }
  0x11   : > { %249 = sbr.rel (%p246_p10) target bundleno = 461 (0x1cd), region = 36  ;;  %2166 = vmatprep.subr.bf16.mxu0 (!%p246_p10), %v2711_v1  ;;  %2186 = vmatprep.subr.bf16.mxu1 (!%p246_p10), %v2711_v1  ;;  %v2476_v2 = vld [vmem:[%s3414_s2] sm:$0xff] (!%p246_p10)   ;;  %v2478_v4 = vld [vmem:[%s3414_s2 + $0x8] sm:$0xff] (!%p246_p10)   ;;  %v2480_v6 = vld [vmem:[%s3414_s2 + $0x10] sm:$0xff] (!%p246_p10)   ;;  %vm401_vm1 = vcmask (!%p246_p10), 125952   ;;  %s3266_s8 = sshll.u32 (!%p246_p10), %s2701_s24, 8 }
  0x12   : > { %2167 = vmatpush3.bf16.msra.mxu0 (!%p246_p10), %v2475_v0  ;;  %2182 = vmatprep.mubr.msk.bf16.mxu0 (!%p246_p10), %vm2712_vm0, %v2711_v1  ;;  %v2481_v7 = vld [vmem:[%s3413_s1 + $0x18] sm:$0xff] (!%p246_p10)   ;;  %v2483_v9 = vld [vmem:[%s3413_s1 + $0x20] sm:$0xff] (!%p246_p10)   ;;  %v2485_v11 = vld [vmem:[%s3413_s1 + $0x28] sm:$0xff] (!%p246_p10)   ;;  %s3274_s13 = scalar_lea.hbm (!%p246_p10), %s3416_s4, %s3266_s8  ;;  %s2713_s15 = smov (!%p246_p10), [#allocation2]  }
  0x13   : > { %2187 = vmatpush3.bf16.msra.mxu1 (!%p246_p10), %v2476_v2  ;;  %2168 = vmatprep.subr.bf16.mxu0 (!%p246_p10), %v2711_v1  ;;  %v2482_v8 = vld [vmem:[%s3414_s2 + $0x18] sm:$0xff] (!%p246_p10)   ;;  %v2484_v10 = vld [vmem:[%s3414_s2 + $0x20] sm:$0xff] (!%p246_p10)   ;;  %v2486_v12 = vld [vmem:[%s3414_s2 + $0x28] sm:$0xff] (!%p246_p10)  }
  0x14   : > { %2188 = vmatprep.subr.bf16.mxu1 (!%p246_p10), %v2711_v1  ;;  %2202 = vmatprep.mubr.msk.bf16.mxu1 (!%p246_p10), %vm2712_vm0, %v2711_v1  ;;  %v2487_v13 = vld [vmem:[%s3413_s1 + $0x30] sm:$0xff] (!%p246_p10)   ;;  %v2489_v15 = vld [vmem:[%s3413_s1 + $0x38] sm:$0xff] (!%p246_p10)   ;;  %v2491_v18 = vld [vmem:[%s3415_s3] sm:$0xff] (!%p246_p10)  }
  0x15   : > { %v2488_v14 = vld [vmem:[%s3414_s2 + $0x30] sm:$0xff] (!%p246_p10)   ;;  %v2490_v16 = vld [vmem:[%s3414_s2 + $0x38] sm:$0xff] (!%p246_p10)   ;;  %v2492_v19 = vld [vmem:[%s3413_s1 + $0x40] sm:$0xff] (!%p246_p10)  }
  0x16   : > { %2169 = vmatpush3.bf16.msra.mxu0 (!%p246_p10), %v2477_v3  ;;  %v2493_v20 = vld [vmem:[%s3415_s3 + $0x8] sm:$0xff] (!%p246_p10)   ;;  %v2495_v22 = vld [vmem:[%s3415_s3 + $0x10] sm:$0xff] (!%p246_p10)   ;;  %v2497_v24 = vld [vmem:[%s3415_s3 + $0x18] sm:$0xff] (!%p246_p10)  }
  0x17   : > { %2189 = vmatpush3.bf16.msra.mxu1 (!%p246_p10), %v2478_v4  ;;  %2170 = vmatprep.subr.bf16.mxu0 (!%p246_p10), %v2711_v1  ;;  %v2494_v21 = vld [vmem:[%s3413_s1 + $0x48] sm:$0xff] (!%p246_p10)   ;;  %v2496_v23 = vld [vmem:[%s3413_s1 + $0x50] sm:$0xff] (!%p246_p10)   ;;  %v2498_v25 = vld [vmem:[%s3413_s1 + $0x58] sm:$0xff] (!%p246_p10)  }
  0x18   : > { %2190 = vmatprep.subr.bf16.mxu1 %v2711_v1  ;;  %s288_s11 = scalar_select %p287_p11, %s2701_s24, 1  ;;  %v2499_v26 = vld [vmem:[%s3415_s3 + $0x20] sm:$0xff]   ;;  %v2501_v28 = vld [vmem:[%s3415_s3 + $0x28] sm:$0xff]   ;;  %v2503_v30 = vld [vmem:[%s3415_s3 + $0x30] sm:$0xff]  }
  0x19   : > { %v2500_v27 = vld [vmem:[%s3413_s1 + $0x60] sm:$0xff]   ;;  %v2502_v29 = vld [vmem:[%s3413_s1 + $0x68] sm:$0xff]   ;;  %v2504_v31 = vld [vmem:[%s3413_s1 + $0x70] sm:$0xff]  }
  0x1a   : > { %2171 = vmatpush3.bf16.msra.mxu0 %v2479_v5  ;;  %s1794_s16 = sshll.u32 %s288_s11, 2  ;;  %v2505_v32 = vld [vmem:[%s3415_s3 + $0x38] sm:$0xff]   ;;  %v2507_v34 = vld [vmem:[%s3414_s2 + $0x40] sm:$0xff]   ;;  %v2509_v36 = vld [vmem:[%s3414_s2 + $0x48] sm:$0xff]  }
  0x1b   : > { %2191 = vmatpush3.bf16.msra.mxu1 %v2480_v6  ;;  %2172 = vmatprep.subr.bf16.mxu0 %v2711_v1  ;;  %s293_s30 = scalar_lea.vmem %s3412_s0, %s1794_s16  ;;  %v2506_v33 = vld [vmem:[%s3413_s1 + $0x78] sm:$0xff]   ;;  %v2508_v35 = vld [vmem:[%s3415_s3 + $0x40] sm:$0xff]   ;;  %v2510_v37 = vld [vmem:[%s3415_s3 + $0x48] sm:$0xff]   ;;  %s270_s16 = sand.u32 1, %s2693_s22  }
  0x1c   : > { %2192 = vmatprep.subr.bf16.mxu1 %v2711_v1  ;;  %v2885_v17 = vld [vmem:[%s293_s30] sm:$0xf]  ;;  %v2511_v38 = vld [vmem:[%s3414_s2 + $0x50] sm:$0xff]   ;;  %v2513_v40 = vld [vmem:[%s3414_s2 + $0x58] sm:$0xff]   ;;  %s1791_s17 = sshll.u32 %s270_s16, 4  ;;  %s3282_s24 = scalar_lea.sflag [#allocation3], %s270_s16 }
  0x1d   : > { %v2512_v39 = vld [vmem:[%s3415_s3 + $0x50] sm:$0xff]   ;;  %v2514_v41 = vld [vmem:[%s3415_s3 + $0x58] sm:$0xff]   ;;  %v2515_v42 = vld [vmem:[%s3414_s2 + $0x60] sm:$0xff]   ;;  %s3242_s18 = scalar_lea.vmem [#allocation2], %s1791_s17  ;;  %s3246_s19 = scalar_lea.vmem [#allocation4], %s1791_s17 }
  0x1e   : > { %2173 = vmatpush3.bf16.msra.mxu0 %v2481_v7  ;;  %v2516_v43 = vld [vmem:[%s3415_s3 + $0x60] sm:$0xff]   ;;  %v2517_v44 = vld [vmem:[%s3414_s2 + $0x68] sm:$0xff]   ;;  %v2519_v46 = vld [vmem:[%s3414_s2 + $0x70] sm:$0xff]   ;;  %s3250_s20 = scalar_lea.vmem [#allocation6], %s1791_s17  ;;  %s1612_s30 = sshll.u32 %s3242_s18, 4  ;;  %s3268_s30 = int_to_ptr.vmem [resolvable:$true] %s1612_s30 }
  0x1f   : > { %2193 = vmatpush3.bf16.msra.mxu1 %v2482_v8  ;;  %2174 = vmatprep.subr.bf16.mxu0 %v2711_v1  ;;  %v2518_v45 = vld [vmem:[%s3415_s3 + $0x68] sm:$0xff]   ;;  %v2520_v47 = vld [vmem:[%s3415_s3 + $0x70] sm:$0xff]   ;;  %v2521_v48 = vld [vmem:[%s3414_s2 + $0x78] sm:$0xff]   ;;  %s2571_s14 = scalar_lea.vmem %s3268_s30, 256  ;;  %s2575_s17 = sshll.u32 %s2713_s15, 4  ;;  %s2576_s17 = int_to_ptr.vmem [resolvable:$false] %s2575_s17 }
  0x20   : > { %2194 = vmatprep.subr.bf16.mxu1 %v2711_v1  ;;  %v2522_v49 = vld [vmem:[%s3415_s3 + $0x78] sm:$0xff]   ;;  %v2523_v50 = vld [vmem:[%s3413_s1 + $0x80] sm:$0xff]   ;;  %v2525_v52 = vld [vmem:[%s3413_s1 + $0x88] sm:$0xff]   ;;  %p2572_p12 = scmp.ne.s32.totalorder %s3268_s30, %s2571_s14  ;;  %s2577_s12 = scalar_lea.vmem %s2576_s17, 512 }
  0x21   : > { %v2524_v51 = vld [vmem:[%s3414_s2 + $0x80] sm:$0xff]   ;;  %v2526_v53 = vld [vmem:[%s3414_s2 + $0x88] sm:$0xff]   ;;  %v2527_v54 = vld [vmem:[%s3413_s1 + $0x90] sm:$0xff]   ;;  %p2578_p1 = scmp.lt.s32.totalorder %s3268_s30, %s2576_s17  ;;  %p2579_p2 = scmp.lt.s32.totalorder %s2577_s12, %s2571_s14 }
  0x22   : > { %2175 = vmatpush3.bf16.msra.mxu0 %v2483_v9  ;;  %v2528_v55 = vld [vmem:[%s3414_s2 + $0x90] sm:$0xff]   ;;  %v2529_v56 = vld [vmem:[%s3413_s1 + $0x98] sm:$0xff]   ;;  %v2531_v58 = vld [vmem:[%s3413_s1 + $0xa0] sm:$0xff]   ;;  %p2573_p13 = pnand %p2572_p12, %p2795_p4 }
  0x23   : > { %2195 = vmatpush3.bf16.msra.mxu1 %v2484_v10  ;;  %2176 = vmatprep.subr.bf16.mxu0 %v2711_v1  ;;  %v2530_v57 = vld [vmem:[%s3414_s2 + $0x98] sm:$0xff]   ;;  %v2532_v59 = vld [vmem:[%s3414_s2 + $0xa0] sm:$0xff]   ;;  %v2533_v60 = vld [vmem:[%s3413_s1 + $0xa8] sm:$0xff]   ;;  %p2580_p3 = por %p2579_p2, %p2578_p1 }
  0x24   : > { %2196 = vmatprep.subr.bf16.mxu1 %v2711_v1  ;;  %v2534_v61 = vld [vmem:[%s3414_s2 + $0xa8] sm:$0xff]   ;;  %v2535_v62 = vld [vmem:[%s3413_s1 + $0xb0] sm:$0xff]   ;;  %v2537_v0 = vld [vmem:[%s3413_s1 + $0xb8] sm:$0xff]   ;;  %p2574_p0 = pneg %p2573_p13 }
  0x25   : > { %v2536_v63 = vld [vmem:[%s3414_s2 + $0xb0] sm:$0xff]   ;;  %v2538_v2 = vld [vmem:[%s3414_s2 + $0xb8] sm:$0xff]   ;;  %v2539_v3 = vld [vmem:[%s3415_s3 + $0x80] sm:$0xff]  }
  0x26   : > { %2177 = vmatpush3.bf16.msra.mxu0 %v2485_v11  ;;  %v2540_v4 = vld [vmem:[%s3413_s1 + $0xc0] sm:$0xff]   ;;  %v2541_v5 = vld [vmem:[%s3415_s3 + $0x88] sm:$0xff]   ;;  %v2543_v7 = vld [vmem:[%s3415_s3 + $0x90] sm:$0xff]   ;;  %p2581_p5 = pnand %p2580_p3, %p2574_p0 }
  0x27   : > { %2197 = vmatpush3.bf16.msra.mxu1 %v2486_v12  ;;  %2178 = vmatprep.subr.bf16.mxu0 %v2711_v1  ;;  %v2542_v6 = vld [vmem:[%s3413_s1 + $0xc8] sm:$0xff]   ;;  %v2544_v8 = vld [vmem:[%s3413_s1 + $0xd0] sm:$0xff]   ;;  %v2545_v9 = vld [vmem:[%s3415_s3 + $0x98] sm:$0xff]  }
  0x28   : > { %2198 = vmatprep.subr.bf16.mxu1 %v2711_v1  ;;  %v2546_v10 = vld [vmem:[%s3413_s1 + $0xd8] sm:$0xff]   ;;  %v2547_v11 = vld [vmem:[%s3415_s3 + $0xa0] sm:$0xff]  }
  0x29   : > { %v2548_v12 = vld [vmem:[%s3413_s1 + $0xe0] sm:$0xff]  }
  0x2a   : > { %2179 = vmatpush3.bf16.msra.mxu0 %v2487_v13  ;;  %v2549_v13 = vld [vmem:[%s3415_s3 + $0xa8] sm:$0xff]  }
  0x2b   : > { %2199 = vmatpush3.bf16.msra.mxu1 %v2488_v14  ;;  %2180 = vmatprep.subr.bf16.mxu0 %v2711_v1  ;;  %v2550_v14 = vld [vmem:[%s3413_s1 + $0xe8] sm:$0xff]  }
  0x2c   : > { %2200 = vmatprep.subr.bf16.mxu1 %v2711_v1 }
  0x2e   : > { %2181 = vmatpush3.bf16.msra.mxu0 %v2489_v15  ;;  %v2551_v15 = vld [vmem:[%s3415_s3 + $0xb0] sm:$0xff]  }
  0x2f   : > { %2201 = vmatpush3.bf16.msra.mxu1 %v2490_v16  ;;  %2206 = vmatprep.subr.bf16.mxu0 %v2711_v1  ;;  %v2552_v16 = vld [vmem:[%s3413_s1 + $0xf0] sm:$0xff]  }
  0x30   : > { %2226 = vmatprep.subr.bf16.mxu1 %v2711_v1 }
  0x31   : > { %2183 = vmatmul.mubr.bf16.vlgmr.msra.gmra.mrb[0].mxu0 %v2885_v17 }
  0x32   : > { %2203 = vmatmul.mubr.bf16.vlgmr.msra.gmra.mrb[0].mxu1 %v2885_v17  ;;  %2207 = vmatpush3.bf16.msra.mxu0 %v2491_v18  ;;  %v2553_v18 = vld [vmem:[%s3415_s3 + $0xb8] sm:$0xff]  }
  0x33   : > { %2227 = vmatpush3.bf16.msra.mxu1 %v2492_v19  ;;  %2208 = vmatprep.subr.bf16.mxu0 %v2711_v1  ;;  %v2554_v19 = vld [vmem:[%s3413_s1 + $0xf8] sm:$0xff]  }
  0x34   : > { %2228 = vmatprep.subr.bf16.mxu1 %v2711_v1  ;;  %2222 = vmatprep.mubr.msk.bf16.mxu0 %vm2712_vm0, %v2711_v1 }
  0x35   : > { %2242 = vmatprep.mubr.msk.bf16.mxu1 %vm2712_vm0, %v2711_v1 }
  0x36   : > { %2209 = vmatpush3.bf16.msra.mxu0 %v2493_v20  ;;  %v2555_v20 = vld [vmem:[%s3414_s2 + $0xc0] sm:$0xff]  }
  0x37   : > { %2229 = vmatpush3.bf16.msra.mxu1 %v2494_v21  ;;  %2210 = vmatprep.subr.bf16.mxu0 %v2711_v1  ;;  %v2556_v21 = vld [vmem:[%s3415_s3 + $0xc0] sm:$0xff]  }
  0x38   : > { %2230 = vmatprep.subr.bf16.mxu1 %v2711_v1 }
  0x3a   : > { %2211 = vmatpush3.bf16.msra.mxu0 %v2495_v22  ;;  %v2557_v22 = vld [vmem:[%s3414_s2 + $0xc8] sm:$0xff]  }
  0x3b   : > { %2231 = vmatpush3.bf16.msra.mxu1 %v2496_v23  ;;  %2212 = vmatprep.subr.bf16.mxu0 %v2711_v1  ;;  %v2558_v23 = vld [vmem:[%s3415_s3 + $0xc8] sm:$0xff]  }
  0x3c   : > { %2232 = vmatprep.subr.bf16.mxu1 %v2711_v1 }
  0x3e   : > { %2213 = vmatpush3.bf16.msra.mxu0 %v2497_v24  ;;  %v2559_v24 = vld [vmem:[%s3414_s2 + $0xd0] sm:$0xff]  }
  0x3f   : > { %2233 = vmatpush3.bf16.msra.mxu1 %v2498_v25  ;;  %2214 = vmatprep.subr.bf16.mxu0 %v2711_v1  ;;  %v2560_v25 = vld [vmem:[%s3415_s3 + $0xd0] sm:$0xff]  }
  0x40   : > { %2234 = vmatprep.subr.bf16.mxu1 %v2711_v1 }
  0x42   : > { %2215 = vmatpush3.bf16.msra.mxu0 %v2499_v26  ;;  %v2561_v26 = vld [vmem:[%s3414_s2 + $0xd8] sm:$0xff]  }
  0x43   : > { %2235 = vmatpush3.bf16.msra.mxu1 %v2500_v27  ;;  %2216 = vmatprep.subr.bf16.mxu0 %v2711_v1  ;;  %v2562_v27 = vld [vmem:[%s3415_s3 + $0xd8] sm:$0xff]  }
  0x44   : > { %2236 = vmatprep.subr.bf16.mxu1 %v2711_v1 }
  0x46   : > { %2217 = vmatpush3.bf16.msra.mxu0 %v2501_v28  ;;  %v2563_v28 = vld [vmem:[%s3414_s2 + $0xe0] sm:$0xff]  }
  0x47   : > { %2237 = vmatpush3.bf16.msra.mxu1 %v2502_v29  ;;  %2218 = vmatprep.subr.bf16.mxu0 %v2711_v1  ;;  %v2564_v29 = vld [vmem:[%s3415_s3 + $0xe0] sm:$0xff]  }
  0x48   : > { %2238 = vmatprep.subr.bf16.mxu1 %v2711_v1 }
  0x4a   : > { %2219 = vmatpush3.bf16.msra.mxu0 %v2503_v30  ;;  %v2565_v30 = vld [vmem:[%s3414_s2 + $0xe8] sm:$0xff]  }
  0x4b   : > { %2239 = vmatpush3.bf16.msra.mxu1 %v2504_v31  ;;  %2220 = vmatprep.subr.bf16.mxu0 %v2711_v1  ;;  %v2566_v31 = vld [vmem:[%s3415_s3 + $0xe8] sm:$0xff]  }
  0x4c   : > { %2240 = vmatprep.subr.bf16.mxu1 %v2711_v1 }
  0x4e   : > { %2221 = vmatpush3.bf16.msra.mxu0 %v2505_v32  ;;  %v2567_v32 = vld [vmem:[%s3414_s2 + $0xf0] sm:$0xff]  }
  0x4f   : > { %2241 = vmatpush3.bf16.msra.mxu1 %v2506_v33  ;;  %2246 = vmatprep.subr.bf16.mxu0 %v2711_v1  ;;  %v2568_v33 = vld [vmem:[%s3415_s3 + $0xf0] sm:$0xff]  }
  0x50   : > { %2266 = vmatprep.subr.bf16.mxu1 %v2711_v1 }
  0x51   : > { %2223 = vmatmul.mubr.bf16.vlgmr.msra.gmra.mrb[4].mxu0 %v2885_v17 }
  0x52   : > { %2243 = vmatmul.mubr.bf16.vlgmr.msra.gmra.mrb[4].mxu1 %v2885_v17  ;;  %2247 = vmatpush3.bf16.msra.mxu0 %v2507_v34  ;;  %v2569_v34 = vld [vmem:[%s3414_s2 + $0xf8] sm:$0xff]  }
  0x53   : > { %2267 = vmatpush3.bf16.msra.mxu1 %v2508_v35  ;;  %2248 = vmatprep.subr.bf16.mxu0 %v2711_v1  ;;  %v2570_v35 = vld [vmem:[%s3415_s3 + $0xf8] sm:$0xff]  }
  0x54   : > { %2268 = vmatprep.subr.bf16.mxu1 %v2711_v1  ;;  %2262 = vmatprep.mubr.msk.bf16.mxu0 %vm2712_vm0, %v2711_v1 }
  0x55   : > { %2282 = vmatprep.mubr.msk.bf16.mxu1 %vm2712_vm0, %v2711_v1 }
  0x56   : > { %2249 = vmatpush3.bf16.msra.mxu0 %v2509_v36 }
  0x57   : > { %2269 = vmatpush3.bf16.msra.mxu1 %v2510_v37  ;;  %2250 = vmatprep.subr.bf16.mxu0 %v2711_v1 }
  0x58   : > { %2270 = vmatprep.subr.bf16.mxu1 %v2711_v1 }
  0x5a   : > { %2251 = vmatpush3.bf16.msra.mxu0 %v2511_v38 }
  0x5b   : > { %2271 = vmatpush3.bf16.msra.mxu1 %v2512_v39  ;;  %2252 = vmatprep.subr.bf16.mxu0 %v2711_v1 }
  0x5c   : > { %2272 = vmatprep.subr.bf16.mxu1 %v2711_v1 }
  0x5e   : > { %2253 = vmatpush3.bf16.msra.mxu0 %v2513_v40 }
  0x5f   : > { %2273 = vmatpush3.bf16.msra.mxu1 %v2514_v41  ;;  %2254 = vmatprep.subr.bf16.mxu0 %v2711_v1 }
  0x60   : > { %2274 = vmatprep.subr.bf16.mxu1 %v2711_v1 }
  0x62   : > { %2255 = vmatpush3.bf16.msra.mxu0 %v2515_v42 }
  0x63   : > { %2275 = vmatpush3.bf16.msra.mxu1 %v2516_v43  ;;  %2256 = vmatprep.subr.bf16.mxu0 %v2711_v1 }
  0x64   : > { %2276 = vmatprep.subr.bf16.mxu1 %v2711_v1 }
  0x66   : > { %2257 = vmatpush3.bf16.msra.mxu0 %v2517_v44 }
  0x67   : > { %2277 = vmatpush3.bf16.msra.mxu1 %v2518_v45  ;;  %2258 = vmatprep.subr.bf16.mxu0 %v2711_v1 }
  0x68   : > { %2278 = vmatprep.subr.bf16.mxu1 %v2711_v1 }
  0x6a   : > { %2259 = vmatpush3.bf16.msra.mxu0 %v2519_v46 }
  0x6b   : > { %2279 = vmatpush3.bf16.msra.mxu1 %v2520_v47  ;;  %2260 = vmatprep.subr.bf16.mxu0 %v2711_v1 }
  0x6c   : > { %2280 = vmatprep.subr.bf16.mxu1 %v2711_v1 }
  0x6e   : > { %2261 = vmatpush3.bf16.msra.mxu0 %v2521_v48 }
  0x6f   : > { %2281 = vmatpush3.bf16.msra.mxu1 %v2522_v49  ;;  %2286 = vmatprep.subr.bf16.mxu0 %v2711_v1 }
  0x70   : > { %2306 = vmatprep.subr.bf16.mxu1 %v2711_v1 }
  0x71   : > { %2263 = vmatmul.mubr.bf16.vlgmr.msra.gmra.mrb[8].mxu0 %v2885_v17 }
  0x72   : > { %2283 = vmatmul.mubr.bf16.vlgmr.msra.gmra.mrb[8].mxu1 %v2885_v17  ;;  %2287 = vmatpush3.bf16.msra.mxu0 %v2523_v50 }
  0x73   : > { %2307 = vmatpush3.bf16.msra.mxu1 %v2524_v51  ;;  %2288 = vmatprep.subr.bf16.mxu0 %v2711_v1 }
  0x74   : > { %2308 = vmatprep.subr.bf16.mxu1 %v2711_v1  ;;  %2302 = vmatprep.mubr.msk.bf16.mxu0 %vm2712_vm0, %v2711_v1 }
  0x75   : > { %2322 = vmatprep.mubr.msk.bf16.mxu1 %vm2712_vm0, %v2711_v1 }
  0x76   : > { %2289 = vmatpush3.bf16.msra.mxu0 %v2525_v52 }
  0x77   : > { %2309 = vmatpush3.bf16.msra.mxu1 %v2526_v53  ;;  %2290 = vmatprep.subr.bf16.mxu0 %v2711_v1 }
  0x78   : > { %2310 = vmatprep.subr.bf16.mxu1 %v2711_v1 }
  0x7a   : > { %2291 = vmatpush3.bf16.msra.mxu0 %v2527_v54 }
  0x7b   : > { %2311 = vmatpush3.bf16.msra.mxu1 %v2528_v55  ;;  %2292 = vmatprep.subr.bf16.mxu0 %v2711_v1 }
  0x7c   : > { %2312 = vmatprep.subr.bf16.mxu1 %v2711_v1 }
  0x7e   : > { %2293 = vmatpush3.bf16.msra.mxu0 %v2529_v56 }
  0x7f   : > { %2313 = vmatpush3.bf16.msra.mxu1 %v2530_v57  ;;  %2294 = vmatprep.subr.bf16.mxu0 %v2711_v1 }
  0x80   : > { %2314 = vmatprep.subr.bf16.mxu1 %v2711_v1 }
  0x82   : > { %2295 = vmatpush3.bf16.msra.mxu0 %v2531_v58 }
  0x83   : > { %2315 = vmatpush3.bf16.msra.mxu1 %v2532_v59  ;;  %2296 = vmatprep.subr.bf16.mxu0 %v2711_v1 }
  0x84   : > { %2316 = vmatprep.subr.bf16.mxu1 %v2711_v1 }
  0x86   : > { %2297 = vmatpush3.bf16.msra.mxu0 %v2533_v60 }
  0x87   : > { %2317 = vmatpush3.bf16.msra.mxu1 %v2534_v61  ;;  %2298 = vmatprep.subr.bf16.mxu0 %v2711_v1 }
  0x88   : > { %2318 = vmatprep.subr.bf16.mxu1 %v2711_v1 }
  0x8a   : > { %2299 = vmatpush3.bf16.msra.mxu0 %v2535_v62 }
  0x8b   : > { %2319 = vmatpush3.bf16.msra.mxu1 %v2536_v63  ;;  %2300 = vmatprep.subr.bf16.mxu0 %v2711_v1 }
  0x8c   : > { %2320 = vmatprep.subr.bf16.mxu1 %v2711_v1 }
  0x8e   : > { %2301 = vmatpush3.bf16.msra.mxu0 %v2537_v0 }
  0x8f   : > { %2321 = vmatpush3.bf16.msra.mxu1 %v2538_v2  ;;  %2326 = vmatprep.subr.bf16.mxu0 %v2711_v1 }
  0x90   : > { %2346 = vmatprep.subr.bf16.mxu1 %v2711_v1 }
  0x91   : > { %2303 = vmatmul.mubr.bf16.vlgmr.msra.gmra.mrb[12].mxu0 %v2885_v17 }
  0x92   : > { %2323 = vmatmul.mubr.bf16.vlgmr.msra.gmra.mrb[12].mxu1 %v2885_v17  ;;  %2327 = vmatpush3.bf16.msra.mxu0 %v2539_v3 }
  0x93   : > { %2347 = vmatpush3.bf16.msra.mxu1 %v2540_v4  ;;  %2328 = vmatprep.subr.bf16.mxu0 %v2711_v1 }
  0x94   : > { %2348 = vmatprep.subr.bf16.mxu1 %v2711_v1  ;;  %2342 = vmatprep.mubr.msk.bf16.mxu0 %vm2712_vm0, %v2711_v1 }
  0x95   : > { %2362 = vmatprep.mubr.msk.bf16.mxu1 %vm2712_vm0, %v2711_v1 }
  0x96   : > { %2329 = vmatpush3.bf16.msra.mxu0 %v2541_v5 }
  0x97   : > { %2349 = vmatpush3.bf16.msra.mxu1 %v2542_v6  ;;  %2330 = vmatprep.subr.bf16.mxu0 %v2711_v1 }
  0x98   : > { %2350 = vmatprep.subr.bf16.mxu1 %v2711_v1 }
  0x9a   : > { %2331 = vmatpush3.bf16.msra.mxu0 %v2543_v7 }
  0x9b   : > { %2351 = vmatpush3.bf16.msra.mxu1 %v2544_v8  ;;  %2332 = vmatprep.subr.bf16.mxu0 %v2711_v1 }
  0x9c   : > { %2352 = vmatprep.subr.bf16.mxu1 %v2711_v1 }
  0x9e   : > { %2333 = vmatpush3.bf16.msra.mxu0 %v2545_v9 }
  0x9f   : > { %2353 = vmatpush3.bf16.msra.mxu1 %v2546_v10  ;;  %2334 = vmatprep.subr.bf16.mxu0 %v2711_v1 }
  0xa0   : > { %2354 = vmatprep.subr.bf16.mxu1 %v2711_v1 }
  0xa2   : > { %2335 = vmatpush3.bf16.msra.mxu0 %v2547_v11 }
  0xa3   : > { %2355 = vmatpush3.bf16.msra.mxu1 %v2548_v12  ;;  %2336 = vmatprep.subr.bf16.mxu0 %v2711_v1 }
  0xa4   : > { %2356 = vmatprep.subr.bf16.mxu1 %v2711_v1 }
  0xa6   : > { %2337 = vmatpush3.bf16.msra.mxu0 %v2549_v13 }
  0xa7   : > { %2357 = vmatpush3.bf16.msra.mxu1 %v2550_v14  ;;  %2338 = vmatprep.subr.bf16.mxu0 %v2711_v1 }
  0xa8   : > { %2358 = vmatprep.subr.bf16.mxu1 %v2711_v1 }
  0xaa   : > { %2339 = vmatpush3.bf16.msra.mxu0 %v2551_v15 }
  0xab   : > { %2359 = vmatpush3.bf16.msra.mxu1 %v2552_v16  ;;  %2340 = vmatprep.subr.bf16.mxu0 %v2711_v1 }
  0xac   : > { %2360 = vmatprep.subr.bf16.mxu1 %v2711_v1 }
  0xae   : > { %2341 = vmatpush3.bf16.msra.mxu0 %v2553_v18 }
  0xaf   : > { %2361 = vmatpush3.bf16.msra.mxu1 %v2554_v19  ;;  %2366 = vmatprep.subr.bf16.mxu0 %v2711_v1 }
  0xb0   : > { %2386 = vmatprep.subr.bf16.mxu1 %v2711_v1 }
  0xb1   : > { %2343 = vmatmul.mubr.bf16.vlgmr.msra.gmra.mrb[16].mxu0 %v2885_v17 }
  0xb2   : > { %2363 = vmatmul.mubr.bf16.vlgmr.msra.gmra.mrb[16].mxu1 %v2885_v17  ;;  %2367 = vmatpush3.bf16.msra.mxu0 %v2555_v20 }
  0xb3   : > { %2387 = vmatpush3.bf16.msra.mxu1 %v2556_v21  ;;  %2368 = vmatprep.subr.bf16.mxu0 %v2711_v1 }
  0xb4   : > { %2388 = vmatprep.subr.bf16.mxu1 %v2711_v1  ;;  %2382 = vmatprep.mubr.msk.bf16.mxu0 %vm2712_vm0, %v2711_v1 }
  0xb5   : > { %2402 = vmatprep.mubr.msk.bf16.mxu1 %vm2712_vm0, %v2711_v1 }
  0xb6   : > { %2369 = vmatpush3.bf16.msra.mxu0 %v2557_v22 }
  0xb7   : > { %2389 = vmatpush3.bf16.msra.mxu1 %v2558_v23  ;;  %2370 = vmatprep.subr.bf16.mxu0 %v2711_v1 }
  0xb8   : > { %2390 = vmatprep.subr.bf16.mxu1 %v2711_v1 }
  0xba   : > { %2371 = vmatpush3.bf16.msra.mxu0 %v2559_v24 }
  0xbb   : > { %2391 = vmatpush3.bf16.msra.mxu1 %v2560_v25  ;;  %2372 = vmatprep.subr.bf16.mxu0 %v2711_v1 }
  0xbc   : > { %2392 = vmatprep.subr.bf16.mxu1 %v2711_v1 }
  0xbe   : > { %2373 = vmatpush3.bf16.msra.mxu0 %v2561_v26 }
  0xbf   : > { %2393 = vmatpush3.bf16.msra.mxu1 %v2562_v27  ;;  %2374 = vmatprep.subr.bf16.mxu0 %v2711_v1 }
  0xc0   : > { %2394 = vmatprep.subr.bf16.mxu1 %v2711_v1 }
  0xc2   : > { %2375 = vmatpush3.bf16.msra.mxu0 %v2563_v28 }
  0xc3   : > { %2395 = vmatpush3.bf16.msra.mxu1 %v2564_v29  ;;  %2376 = vmatprep.subr.bf16.mxu0 %v2711_v1 }
  0xc4   : > { %2396 = vmatprep.subr.bf16.mxu1 %v2711_v1 }
  0xc6   : > { %2377 = vmatpush3.bf16.msra.mxu0 %v2565_v30 }
  0xc7   : > { %2397 = vmatpush3.bf16.msra.mxu1 %v2566_v31  ;;  %2378 = vmatprep.subr.bf16.mxu0 %v2711_v1 }
  0xc8   : > { %2398 = vmatprep.subr.bf16.mxu1 %v2711_v1 }
  0xca   : > { %2379 = vmatpush3.bf16.msra.mxu0 %v2567_v32 }
  0xcb   : > { %2399 = vmatpush3.bf16.msra.mxu1 %v2568_v33  ;;  %2380 = vmatprep.subr.bf16.mxu0 %v2711_v1 }
  0xcc   : > { %2400 = vmatprep.subr.bf16.mxu1 %v2711_v1 }
  0xce   : > { %2381 = vmatpush3.bf16.msra.mxu0 %v2569_v34 }
  0xcf   : > { %2401 = vmatpush3.bf16.msra.mxu1 %v2570_v35 }
  0xd1   : > { %2383 = vmatmul.mubr.bf16.vlgmr.msra.gmra.mrb[20].mxu0 %v2885_v17 }
  0xd2   : > { %2403 = vmatmul.mubr.bf16.vlgmr.msra.gmra.mrb[20].mxu1 %v2885_v17 }
 0x104   : > { %v394_v36 = vpop.f32.mrb[0].mxu0 }
 0x105   : > { %v400_v37 = vpack.c.bf16 %v394_v36, %v394_v36  ;;  %v501_v38 = vpop.f32.mrb[0].mxu1  ;;  %v2184_v39 = vpop.f32.mrb[1].mxu0 }
 0x106   : > { %v507_v40 = vpack.c.bf16 %v501_v38, %v501_v38  ;;  %v2204_v41 = vpop.f32.mrb[1].mxu1  ;;  %v397_v42 = vpop.f32.mrb[2].mxu0 }
 0x107   : > { %402 = vst.msk [vmem:[%s3242_s18] sm:$0xf] %vm401_vm1, %v400_v37  ;;  %v504_v1 = vpop.f32.mrb[2].mxu1  ;;  %v2185_v43 = vpop.f32.mrb[3].mxu0 }
 0x108   : > { %508 = vst.msk [vmem:[%s3246_s19] sm:$0xf] %vm401_vm1, %v507_v40  ;;  %v2205_v17 = vpop.f32.mrb[3].mxu1 }
 0x124   : > { %v607_v44 = vpop.f32.mrb[4].mxu0 }
 0x125   : > { %v613_v45 = vpack.c.bf16 %v607_v44, %v607_v44  ;;  %v714_v46 = vpop.f32.mrb[4].mxu1  ;;  %v2224_v47 = vpop.f32.mrb[5].mxu0 }
 0x126   : > { %v720_v48 = vpack.c.bf16 %v714_v46, %v714_v46  ;;  %v2244_v49 = vpop.f32.mrb[5].mxu1  ;;  %v610_v50 = vpop.f32.mrb[6].mxu0 }
 0x127   : > { %614 = vst.msk [vmem:[%s3250_s20] sm:$0xf] %vm401_vm1, %v613_v45  ;;  %v717_v51 = vpop.f32.mrb[6].mxu1  ;;  %v2225_v52 = vpop.f32.mrb[7].mxu0 }
 0x128   : > { %1843 = vst.msk [vmem:[%s3242_s18 + $0x4] sm:$0xf] %vm401_vm1, %v720_v48  ;;  %v2245_v53 = vpop.f32.mrb[7].mxu1 }
 0x144   : > { %v822_v54 = vpop.f32.mrb[8].mxu0 }
 0x145   : > { %v828_v55 = vpack.c.bf16 %v822_v54, %v822_v54  ;;  %v930_v56 = vpop.f32.mrb[8].mxu1  ;;  %v2264_v57 = vpop.f32.mrb[9].mxu0 }
 0x146   : > { %v936_v58 = vpack.c.bf16 %v930_v56, %v930_v56  ;;  %v2284_v59 = vpop.f32.mrb[9].mxu1  ;;  %v825_v60 = vpop.f32.mrb[10].mxu0 }
 0x147   : > { %1868 = vst.msk [vmem:[%s3246_s19 + $0x4] sm:$0xf] %vm401_vm1, %v828_v55  ;;  %v933_v61 = vpop.f32.mrb[10].mxu1  ;;  %v2265_v62 = vpop.f32.mrb[11].mxu0 }
 0x148   : > { %1893 = vst.msk [vmem:[%s3250_s20 + $0x4] sm:$0xf] %vm401_vm1, %v936_v58  ;;  %v2285_v63 = vpop.f32.mrb[11].mxu1 }
 0x164   : > { %v1038_v0 = vpop.f32.mrb[12].mxu0 }
 0x165   : > { %v1044_v2 = vpack.c.bf16 %v1038_v0, %v1038_v0  ;;  %v1146_v3 = vpop.f32.mrb[12].mxu1  ;;  %v2304_v4 = vpop.f32.mrb[13].mxu0 }
 0x166   : > { %v1152_v5 = vpack.c.bf16 %v1146_v3, %v1146_v3  ;;  %v2324_v6 = vpop.f32.mrb[13].mxu1  ;;  %v1041_v7 = vpop.f32.mrb[14].mxu0 }
 0x167   : > { %1918 = vst.msk [vmem:[%s3242_s18 + $0x8] sm:$0xf] %vm401_vm1, %v1044_v2  ;;  %v1149_v8 = vpop.f32.mrb[14].mxu1  ;;  %v2305_v9 = vpop.f32.mrb[15].mxu0 }
 0x168   : > { %1943 = vst.msk [vmem:[%s3246_s19 + $0x8] sm:$0xf] %vm401_vm1, %v1152_v5  ;;  %v2325_v10 = vpop.f32.mrb[15].mxu1 }
 0x184   : > { %v1254_v11 = vpop.f32.mrb[16].mxu0 }
 0x185   : > { %v1260_v12 = vpack.c.bf16 %v1254_v11, %v1254_v11  ;;  %v1362_v13 = vpop.f32.mrb[16].mxu1  ;;  %v2344_v14 = vpop.f32.mrb[17].mxu0 }
 0x186   : > { %v1368_v15 = vpack.c.bf16 %v1362_v13, %v1362_v13  ;;  %v2364_v16 = vpop.f32.mrb[17].mxu1  ;;  %v1257_v18 = vpop.f32.mrb[18].mxu0 }
 0x187   : > { %1968 = vst.msk [vmem:[%s3250_s20 + $0x8] sm:$0xf] %vm401_vm1, %v1260_v12  ;;  %v1365_v19 = vpop.f32.mrb[18].mxu1  ;;  %v2345_v20 = vpop.f32.mrb[19].mxu0 }
 0x188   : > { %1993 = vst.msk [vmem:[%s3242_s18 + $0xc] sm:$0xf] %vm401_vm1, %v1368_v15  ;;  %v2365_v21 = vpop.f32.mrb[19].mxu1 }
 0x189   : > { %2584 = shalt.err (!%p2581_p5)
}
 0x18a   : > { %s2585_s16 = scalar_lea.hbm %s3274_s13, 256  ;;  %s2589_s15 = scalar_lea.hbm %s3416_s4, 512 }
 0x18b   : > { %p2586_p6 = scmp.ne.s32.totalorder %s3274_s13, %s2585_s16  ;;  %p2590_p10 = scmp.lt.u32.totalorder %s3274_s13, %s3416_s4 }
 0x18c   : > { %p2591_p11 = scmp.lt.u32.totalorder %s2589_s15, %s2585_s16  ;;  %p2593_p13 = scmp.lt.u32.totalorder %s2585_s16, %s3274_s13 }
 0x18d   : > { %p2587_p7 = pnand %p2586_p6, %p2795_p4 }
 0x18e   : > { %p2592_p12 = por %p2591_p11, %p2590_p10 }
 0x18f   : > { %p2588_p9 = pneg %p2587_p7 }
 0x190   : > { %p2594_p0 = por %p2593_p13, %p2592_p12 }
 0x192   : > { %p2595_p1 = pnand %p2594_p0, %p2588_p9 }
 0x194   : > { %2598 = shalt.err (!%p2595_p1)
}
 0x195   : > { %s3420_s14 = smov 64   ;;  %s2715_s12 = smov 4  }
 0x196   : > { %2406 = dma.vmem_to_hbm [thread:$0]  (%p2795_p4), %s3268_s30, 256, %s3274_s13, %s3282_s24, %s3420_s14, %s3420_s14, %s2715_s12  }
 0x197   : > { %s1629_s28 = sshll.u32 %s3246_s19, 4  ;;  %s3312_s16 = sand.u32 1, %s1786_s27   ;;  %s3315_s28 = int_to_ptr.vmem [resolvable:$true] %s1629_s28 }
 0x198   : > { %s1646_s18 = sshll.u32 %s3250_s20, 4  ;;  %s3321_s30 = scalar_lea.hbm %s3417_s5, %s3266_s8  ;;  %s3323_s18 = int_to_ptr.vmem [resolvable:$true] %s1646_s18 }
 0x199   : > { %s3329_s24 = scalar_lea.hbm %s3418_s6, %s3266_s8  ;;  %s1593_s17 = scalar_lea.sflag [#allocation5], %s3312_s16 }
 0x19a   : > { %s2599_s11 = scalar_lea.vmem %s3315_s28, 256  ;;  %s2716_s15 = smov [#allocation4]  }
 0x19b   : > { %p2600_p2 = scmp.ne.s32.totalorder %s3315_s28, %s2599_s11  ;;  %s2603_s14 = sshll.u32 %s2716_s15, 4  ;;  %s2604_s14 = int_to_ptr.vmem [resolvable:$false] %s2603_s14 }
 0x19c   : > { %s2605_s27 = scalar_lea.vmem %s2604_s14, 512  ;;  %p2606_p6 = scmp.lt.s32.totalorder %s3315_s28, %s2604_s14 }
 0x19d   : > { %p2601_p3 = pnand %p2600_p2, %p2795_p4  ;;  %p2607_p7 = scmp.lt.s32.totalorder %s2605_s27, %s2599_s11 }
 0x19f   : > { %p2602_p5 = pneg %p2601_p3  ;;  %p2608_p9 = por %p2607_p7, %p2606_p6 }
 0x1a1   : > { %p2609_p10 = pnand %p2608_p9, %p2602_p5 }
 0x1a4   : > { %v1470_v22 = vpop.f32.mrb[20].mxu0 }
 0x1a5   : > { %v1476_v23 = vpack.c.bf16 %v1470_v22, %v1470_v22  ;;  %v1578_v24 = vpop.f32.mrb[20].mxu1  ;;  %v2384_v25 = vpop.f32.mrb[21].mxu0 }
 0x1a6   : > { %v1584_v26 = vpack.c.bf16 %v1578_v24, %v1578_v24  ;;  %v2404_v27 = vpop.f32.mrb[21].mxu1  ;;  %v1473_v28 = vpop.f32.mrb[22].mxu0 }
 0x1a7   : > { %2018 = vst.msk [vmem:[%s3246_s19 + $0xc] sm:$0xf] %vm401_vm1, %v1476_v23  ;;  %v1581_v29 = vpop.f32.mrb[22].mxu1  ;;  %v2385_v30 = vpop.f32.mrb[23].mxu0 }
 0x1a8   : > { %2043 = vst.msk [vmem:[%s3250_s20 + $0xc] sm:$0xf] %vm401_vm1, %v1584_v26  ;;  %v2405_v31 = vpop.f32.mrb[23].mxu1 }
 0x1a9   : > { %2612 = shalt.err (!%p2609_p10)
}
 0x1aa   : > { %s2613_s19 = scalar_lea.hbm %s3321_s30, 256  ;;  %s2617_s13 = scalar_lea.hbm %s3417_s5, 512 }
 0x1ab   : > { %p2614_p11 = scmp.ne.s32.totalorder %s3321_s30, %s2613_s19  ;;  %p2618_p0 = scmp.lt.u32.totalorder %s3321_s30, %s3417_s5 }
 0x1ac   : > { %p2619_p1 = scmp.lt.u32.totalorder %s2617_s13, %s2613_s19  ;;  %p2621_p3 = scmp.lt.u32.totalorder %s2613_s19, %s3321_s30 }
 0x1ad   : > { %p2615_p12 = pnand %p2614_p11, %p2795_p4 }
 0x1ae   : > { %p2620_p2 = por %p2619_p1, %p2618_p0 }
 0x1af   : > { %p2616_p13 = pneg %p2615_p12 }
 0x1b0   : > { %p2622_p5 = por %p2621_p3, %p2620_p2 }
 0x1b2   : > { %p2623_p6 = pnand %p2622_p5, %p2616_p13 }
 0x1b4   : > { %2626 = shalt.err (!%p2623_p6)
}
 0x1b5   : > { %s3424_s11 = smov 64   ;;  %s2627_s27 = scalar_lea.vmem %s3323_s18, 256 }
 0x1b6   : > { %2407 = dma.vmem_to_hbm [thread:$0]  (%p2795_p4), %s3315_s28, 256, %s3321_s30, %s1593_s17, %s3424_s11, %s3424_s11, %s2715_s12  }
 0x1b7   : > { %p2628_p7 = scmp.ne.s32.totalorder %s3323_s18, %s2627_s27  ;;  %s2717_s19 = smov [#allocation6]  }
 0x1b8   : > { %s2631_s20 = sshll.u32 %s2717_s19, 4  ;;  %s2632_s20 = int_to_ptr.vmem [resolvable:$false] %s2631_s20 }
 0x1b9   : > { %p2629_p9 = pnand %p2628_p7, %p2795_p4  ;;  %s2633_s8 = scalar_lea.vmem %s2632_s20, 512 }
 0x1ba   : > { %p2634_p11 = scmp.lt.s32.totalorder %s3323_s18, %s2632_s20  ;;  %p2635_p12 = scmp.lt.s32.totalorder %s2633_s8, %s2627_s27 }
 0x1bb   : > { %p2630_p10 = pneg %p2629_p9 }
 0x1bc   : > { %p2636_p13 = por %p2635_p12, %p2634_p11 }
 0x1be   : > { %p2637_p0 = pnand %p2636_p13, %p2630_p10 }
 0x1c0   : > { %2640 = shalt.err (!%p2637_p0)
}
 0x1c1   : > { %s2641_s28 = scalar_lea.hbm %s3329_s24, 256  ;;  %s2645_s15 = scalar_lea.hbm %s3418_s6, 512 }
 0x1c2   : > { %p2642_p1 = scmp.ne.s32.totalorder %s3329_s24, %s2641_s28  ;;  %p2646_p5 = scmp.lt.u32.totalorder %s3329_s24, %s3418_s6 }
 0x1c3   : > { %p2647_p6 = scmp.lt.u32.totalorder %s2645_s15, %s2641_s28  ;;  %p2649_p9 = scmp.lt.u32.totalorder %s2641_s28, %s3329_s24 }
 0x1c4   : > { %p2643_p2 = pnand %p2642_p1, %p2795_p4 }
 0x1c5   : > { %p2648_p7 = por %p2647_p6, %p2646_p5 }
 0x1c6   : > { %p2644_p3 = pneg %p2643_p2 }
 0x1c7   : > { %p2650_p10 = por %p2649_p9, %p2648_p7 }
 0x1c9   : > { %p2651_p11 = pnand %p2650_p10, %p2644_p3 }
 0x1cb   : > { %2654 = shalt.err (!%p2651_p11)
}
 0x1cc   : > { %2408 = dma.vmem_to_hbm [thread:$0]  (%p2795_p4), %s3323_s18, 256, %s3329_s24, %s1593_s17, %s3424_s11, %s3424_s11, %s2715_s12  }
 0x1cd PF: > { %p2422_p12 = scmp.ge.s32.totalorder %s2709_s26, 2  ;;  %s1661_s27 = sand.u32 1, %s2689_s21  }
 0x1ce   : > { %s1662_s20 = scalar_lea.sflag [#allocation3], %s1661_s27 }
 0x1cf   : > { %p2413_p13 = pnand %p2422_p12, %p2804_p8 }
 0x1d1   : > { %2680 = dma.done.wait (!%p2413_p13), %s1662_s20, 256  }
 0x1d2   : > { %2682 = vsyncadd (!%p2413_p13), %s1662_s20, 4294967040  ;;  %s3425_s7 = sadd.s32 4294967294, %s2709_s26  }
 0x1d3   : > { %s1670_s8 = sand.u32 1, %s3425_s7  }
 0x1d4   : > { %s1671_s28 = scalar_lea.sflag [#allocation5], %s1670_s8 }
 0x1d5   : > { %2684 = dma.done.wait (!%p2413_p13), %s1671_s28, 512  }
 0x1d6   : > { %2686 = vsyncadd (!%p2413_p13), %s1671_s28, 4294966784  ;;  %s23_s26 = sadd.s32 1, %s2709_s26   ;;  %s3426_s21 = smov %s2693_s22 }
 0x1d7   : > { %p20_p4 = scmp.ge.s32.totalorder %s23_s26, 4   ;;  %s3427_s22 = smov %s2697_s23 }
 0x1d8   : > { %s3428_s23 = smov %s2810_s10  ;;  %s3429_s24 = smov %s2705_s25 }
 0x1d9   : > { %s3430_s25 = smov %s3432_s29  ;;  %22 = sbr.rel (!%p20_p4) target bundleno = 6 (0x6), region = 121 }
 0x1e0   :  { %1685 = vsyncpa [#allocation3], 1 }
 0x1e1   :  { %1687 = vsyncpa [#allocation3 + $0x1], 1 }
 0x1e2   :  { %1688 = vsyncpa [#allocation5], 1 }
 0x1e3   :  { %1690 = vsyncpa [#allocation5 + $0x1], 1 }

</bundles_post_ra>
